<compile_context>
chip_gen: v7x
topology: tpu7x:2x2x1
jax: 0.10.0
libtpu: 0.0.40
codegen_flags: <defaults>
</compile_context>

<pallas_src>
import functools
import math

import jax
import jax.numpy as jnp
from jax.experimental import pallas as pl
from jax.experimental.pallas import tpu as pltpu


def _pebuse_kernel(p_ref, g_ref, out_ref, *, penalty_constant, batch,
                   tile_rows, fold_k, dim):
    pid = pl.program_id(0)

    p = p_ref[...].astype(jnp.float32)            # (TB, L)   L = fold_k * dim
    g = g_ref[...].astype(jnp.float32)            # (TB, L)

    diff = g - p
    diff_sq = diff * diff
    p_sq = p * p

    if fold_k > 1:
        # Block-diagonal 0/1 selector (L, k): sums each contiguous group of
        # `dim` lanes -> per-original-row squared norms. Runs on the idle MXU;
        # HIGHEST precision keeps f32 accuracy.
        L = fold_k * dim
        li = jax.lax.broadcasted_iota(jnp.int32, (L, fold_k), 0)
        ci = jax.lax.broadcasted_iota(jnp.int32, (L, fold_k), 1)
        sel = jnp.logical_and(li >= ci * dim, li < (ci + 1) * dim)
        sel = sel.astype(jnp.float32)
        diff_sq_norm = jnp.dot(diff_sq, sel,
                               preferred_element_type=jnp.float32,
                               precision=jax.lax.Precision.HIGHEST)   # (TB, k)
        p_sq_norm = jnp.dot(p_sq, sel,
                            preferred_element_type=jnp.float32,
                            precision=jax.lax.Precision.HIGHEST)      # (TB, k)
    else:
        diff_sq_norm = jnp.sum(diff_sq, axis=1, keepdims=True)        # (TB, 1)
        p_sq_norm = jnp.sum(p_sq, axis=1, keepdims=True)              # (TB, 1)

    # 2 * log(||g - p||) == log(||g - p||^2)  (single EUP log, no sqrt)
    difference_log = jnp.log(diff_sq_norm)
    proto_log = (1.0 + penalty_constant) * jnp.log(1.0 - p_sq_norm + 1e-06)
    one_loss = difference_log - proto_log        # constant term added in wrapper

    # Mask rows beyond the true batch (fold padding and/or grid-tail overrun).
    row = jax.lax.broadcasted_iota(jnp.int32, one_loss.shape, 0)
    col = jax.lax.broadcasted_iota(jnp.int32, one_loss.shape, 1)
    orig_row = (pid * tile_rows + row) * fold_k + col
    valid = orig_row < batch

    out_ref[0, 0] = jnp.sum(jnp.where(valid, one_loss, 0.0))


def _pick_tile_rows(batch_rows, lane_dim, itemsize):
    """Padding-aware batch-tile sizing (rows of the folded layout)."""
    lanes_padded = ((lane_dim + 127) // 128) * 128
    sublane_pack = {4: 8, 2: 16, 1: 32}.get(itemsize, 8)
    # Per row: 2 inputs x 2 pipeline buffers in the input dtype, plus ~4 f32
    # compute temporaries (casts / diff / squared terms).
    bytes_per_row = lanes_padded * (2 * 2 * itemsize + 4 * 4)
    budget = 28 * 1024 * 1024          # stays well under the 48 MiB VMEM limit
    rows = max(sublane_pack, budget // bytes_per_row)
    tb = min(batch_rows, rows)
    if tb < batch_rows:
        tb = max(sublane_pack, (tb // sublane_pack) * sublane_pack)
    return int(tb)


def pebuse_penalty(p, g, dimension, penalty_option="dim", mult=1.0):
    """JAX wrapper reproducing PeBusePenalty.forward."""
    if penalty_option == "non":
        penalty_constant = 1.0
    elif penalty_option == "dim":
        penalty_constant = mult * dimension
    else:
        print("~~~~~~~~!Your option is not available, I am choosing!~~~~~~~~")
        penalty_constant = 1.0

    B, D = p.shape
    assert g.shape == (B, D)

    # Lane-dense folding: pack k original rows into one (k*D)-lane row.
    k = max(1, 128 // D) if D < 128 else 1
    if k > 1:
        B_pad = ((B + k - 1) // k) * k
        if B_pad != B:
            # one-time pad copy; padded rows are masked out inside the kernel
            p_in = jnp.pad(p, ((0, B_pad - B), (0, 0)))
            g_in = jnp.pad(g, ((0, B_pad - B), (0, 0)))
        else:
            p_in, g_in = p, g
        p_in = p_in.reshape(B_pad // k, k * D)
        g_in = g_in.reshape(B_pad // k, k * D)
    else:
        p_in, g_in = p, g
    Bf, L = p_in.shape

    itemsize = jnp.dtype(p.dtype).itemsize
    tb = _pick_tile_rows(Bf, L, itemsize)
    num_tiles = (Bf + tb - 1) // tb

    kernel = functools.partial(
        _pebuse_kernel,
        penalty_constant=float(penalty_constant),
        batch=B, tile_rows=tb, fold_k=k, dim=D,
    )

    cost = pl.CostEstimate(
        flops=8 * B * D,                      # sub, 2 muls, 2 reduce chains, mask
        transcendentals=2 * B,                # two logs per row
        bytes_accessed=int(p.size * itemsize
                           + g.size * jnp.dtype(g.dtype).itemsize
                           + num_tiles * 4),
    )

    partial_sums = pl.pallas_call(
        kernel,
        out_shape=jax.ShapeDtypeStruct((num_tiles, 1), jnp.float32),
        grid=(num_tiles,),
        in_specs=[
            pl.BlockSpec((tb, L), lambda i: (i, 0)),
            pl.BlockSpec((tb, L), lambda i: (i, 0)),
        ],
        out_specs=pl.BlockSpec((1, 1), lambda i: (i, 0),
                               memory_space=pltpu.MemorySpace.SMEM),
        compiler_params=pltpu.CompilerParams(
            dimension_semantics=("parallel",),     # 2-TC sharding on v7x
            vmem_limit_bytes=48 * 1024 * 1024,
        ),
        cost_estimate=cost,
    )(p_in, g_in)

    total = jnp.sum(partial_sums)
    return total / jnp.float32(B) + jnp.float32(penalty_constant * math.log(2.0))


def _reference(p, g, dimension, penalty_option="dim", mult=1.0):
    # pure-JAX reference for validation
    if penalty_option == "non":
        c = 1.0
    elif penalty_option == "dim":
        c = mult * dimension
    else:
        c = 1.0
    pf = p.astype(jnp.float32)
    gf = g.astype(jnp.float32)
    diff_norm = jnp.linalg.norm(gf - pf, axis=1)
    difference_log = 2.0 * jnp.log(diff_norm)
    data_norm = jnp.linalg.norm(pf, axis=1)
    proto_difference = 1.0 - data_norm**2 + 1e-06
    proto_log = (1.0 + c) * jnp.log(proto_difference)
    constant_loss = c * math.log(2.0)
    return jnp.mean(difference_log - proto_log + constant_loss)


if __name__ == "__main__":
    key = jax.random.PRNGKey(0)
    B, D = 8, 32  # batch, dimension

    kp, kg = jax.random.split(key)
    # keep ||p|| < 1 so that (1 - ||p||^2) stays positive (as the loss assumes)
    p = 0.1 * jax.random.normal(kp, (B, D), dtype=jnp.float32)
    g = 0.1 * jax.random.normal(kg, (B, D), dtype=jnp.float32)

    loss = pebuse_penalty(p, g, dimension=D, penalty_option="dim", mult=1.0)
    loss = jax.block_until_ready(loss)

    ref = _reference(p, g, dimension=D, penalty_option="dim", mult=1.0)
    assert jnp.allclose(loss, ref, rtol=1e-5, atol=1e-5), (loss, ref)

    print("KERNEL_OK")
</pallas_src>

<mosaic_0001>
module attributes {stable_mosaic.version = 11 : i64} {
  func.func @_pebuse_kernel(%arg0: i32, %arg1: memref<2x128xf32, #tpu.memory_space<vmem>>, %arg2: memref<2x128xf32, #tpu.memory_space<vmem>>, %arg3: memref<1x1xf32, #tpu.memory_space<smem>>) attributes {dimension_semantics = [#tpu.dimension_semantics<parallel>], iteration_bounds = array<i64: 1>, scalar_prefetch = 0 : i64, scratch_operands = 0 : i64, tpu.core_type = #tpu.core_type<tc>, window_params = [{transform_indices = @transform_0, window_bounds = array<i64: 2, 128>}, {transform_indices = @transform_1, window_bounds = array<i64: 2, 128>}, {transform_indices = @transform_2, window_bounds = array<i64: 1, 1>}]} {
    %c0 = arith.constant 0 : index
    %c0_0 = arith.constant 0 : index
    %0 = vector.load %arg1[%c0, %c0_0] : memref<2x128xf32, #tpu.memory_space<vmem>>, vector<2x128xf32>
    %c0_1 = arith.constant 0 : index
    %c0_2 = arith.constant 0 : index
    %1 = vector.load %arg2[%c0_1, %c0_2] : memref<2x128xf32, #tpu.memory_space<vmem>>, vector<2x128xf32>
    %2 = arith.subf %1, %0 : vector<2x128xf32>
    %3 = arith.mulf %2, %2 : vector<2x128xf32>
    %4 = arith.mulf %0, %0 : vector<2x128xf32>
    %5 = tpu.iota {dimensions = array<i32: 0>} : vector<128x4xi32>
    %6 = tpu.iota {dimensions = array<i32: 1>} : vector<128x4xi32>
    %c32_i32 = arith.constant 32 : i32
    %7 = vector.broadcast %c32_i32 : i32 to vector<128x4xi32>
    %8 = arith.muli %6, %7 : vector<128x4xi32>
    %9 = arith.cmpi sge, %5, %8 : vector<128x4xi32>
    %c1_i32 = arith.constant 1 : i32
    %10 = vector.broadcast %c1_i32 : i32 to vector<128x4xi32>
    %11 = arith.addi %6, %10 : vector<128x4xi32>
    %c32_i32_3 = arith.constant 32 : i32
    %12 = vector.broadcast %c32_i32_3 : i32 to vector<128x4xi32>
    %13 = arith.muli %11, %12 : vector<128x4xi32>
    %14 = arith.cmpi slt, %5, %13 : vector<128x4xi32>
    %15 = arith.andi %9, %14 : vector<128x4xi1>
    %16 = arith.extui %15 : vector<128x4xi1> to vector<128x4xi32>
    %17 = arith.sitofp %16 : vector<128x4xi32> to vector<128x4xf32>
    %cst = arith.constant dense<0.000000e+00> : vector<2x4xf32>
    %18 = tpu.matmul %3, %17, %cst {dimension_numbers = #tpu.dot_dimension_numbers<[1], [0], [0], [1], [0, 0, 1, 1], [], []>, precision = #tpu.contract_precision<fp32>} : vector<2x128xf32>, vector<128x4xf32>, vector<2x4xf32> -> vector<2x4xf32>
    %cst_4 = arith.constant dense<0.000000e+00> : vector<2x4xf32>
    %19 = tpu.matmul %4, %17, %cst_4 {dimension_numbers = #tpu.dot_dimension_numbers<[1], [0], [0], [1], [0, 0, 1, 1], [], []>, precision = #tpu.contract_precision<fp32>} : vector<2x128xf32>, vector<128x4xf32>, vector<2x4xf32> -> vector<2x4xf32>
    %20 = math.log %18 : vector<2x4xf32>
    %cst_5 = arith.constant 1.000000e+00 : f32
    %21 = vector.broadcast %cst_5 : f32 to vector<2x4xf32>
    %22 = arith.subf %21, %19 : vector<2x4xf32>
    %cst_6 = arith.constant 9.99999997E-7 : f32
    %23 = vector.broadcast %cst_6 : f32 to vector<2x4xf32>
    %24 = arith.addf %22, %23 : vector<2x4xf32>
    %25 = math.log %24 : vector<2x4xf32>
    %cst_7 = arith.constant 3.300000e+01 : f32
    %26 = vector.broadcast %cst_7 : f32 to vector<2x4xf32>
    %27 = arith.mulf %26, %25 : vector<2x4xf32>
    %28 = arith.subf %20, %27 : vector<2x4xf32>
    %29 = tpu.iota {dimensions = array<i32: 0>} : vector<2x4xi32>
    %30 = tpu.iota {dimensions = array<i32: 1>} : vector<2x4xi32>
    %c2_i32 = arith.constant 2 : i32
    %31 = arith.muli %arg0, %c2_i32 : i32
    %32 = vector.broadcast %31 : i32 to vector<2x4xi32>
    %33 = arith.addi %32, %29 : vector<2x4xi32>
    %c4_i32 = arith.constant 4 : i32
    %34 = vector.broadcast %c4_i32 : i32 to vector<2x4xi32>
    %35 = arith.muli %33, %34 : vector<2x4xi32>
    %36 = arith.addi %35, %30 : vector<2x4xi32>
    %c8_i32 = arith.constant 8 : i32
    %37 = vector.broadcast %c8_i32 : i32 to vector<2x4xi32>
    %38 = arith.cmpi slt, %36, %37 : vector<2x4xi32>
    %cst_8 = arith.constant 0.000000e+00 : f32
    %39 = vector.broadcast %cst_8 : f32 to vector<2x4xf32>
    %40 = arith.select %38, %28, %39 : vector<2x4xi1>, vector<2x4xf32>
    %41 = vector.shape_cast %40 : vector<2x4xf32> to vector<1x2x4xf32>
    %cst_9 = arith.constant dense<0.000000e+00> : vector<1xf32>
    %42 = vector.multi_reduction <add>, %41, %cst_9 [1, 2] : vector<1x2x4xf32> to vector<1xf32>
    %43 = vector.shape_cast %42 : vector<1xf32> to vector<1x1x1xf32>
    %44 = vector.extract %43[0, 0, 0] : f32 from vector<1x1x1xf32>
    %c0_10 = arith.constant 0 : index
    %c0_11 = arith.constant 0 : index
    %45 = memref.load %arg3[%c0_10, %c0_11] : memref<1x1xf32, #tpu.memory_space<smem>>
    memref.store %44, %arg3[%c0_10, %c0_11] : memref<1x1xf32, #tpu.memory_space<smem>>
    return
  }
  func.func @transform_0(%arg0: i32) -> (i32, i32) {
    %c0_i32 = arith.constant 0 : i32
    %c0_i32_0 = arith.constant 0 : i32
    return %arg0, %c0_i32 : i32, i32
  }
  func.func @transform_1(%arg0: i32) -> (i32, i32) {
    %c0_i32 = arith.constant 0 : i32
    %c0_i32_0 = arith.constant 0 : i32
    return %arg0, %c0_i32 : i32, i32
  }
  func.func @transform_2(%arg0: i32) -> (i32, i32) {
    %c0_i32 = arith.constant 0 : i32
    %c0_i32_0 = arith.constant 0 : i32
    return %arg0, %c0_i32 : i32, i32
  }
}

</mosaic_0001>

<bundles_post_ra>
// kernel: tpu_custom_call.1
= control target key start
LH: loop header
LB: loop body
LE: loop exit
PB: predicated region body
PF: predicated region fallthrough
CT: control target
= control target key end

     0   :  { %7 = vsyncpa [#allocation3], 0  ;;  %s3288_s0 = inlined_call_operand.hbm [shape: f32[2,128], index: 0, kind: input, shape index: {}]   ;;  %s3289_s1 = inlined_call_operand.vmem [shape: f32[2,128], index: 1, kind: input, shape index: {}]   ;;  %s3290_s2 = inlined_call_operand.hbm [shape: f32[1,1], index: 2, kind: output, shape index: {}]  }
   0x1   :  { %8 = vsyncpa [#allocation4], 0  ;;  %s2547_s9 = smov [#allocation2]   ;;  %s2511_s13 = scalar_lea.hbm %s3288_s0, 32 }
   0x2   :  { %s15_s10 = sshll.u32 %s2547_s9, 4  ;;  %p2512_p0 = scmp.ne.s32.totalorder %s3288_s0, %s2511_s13  ;;  %s16_s10 = int_to_ptr.vmem [resolvable:$true] %s15_s10 }
   0x3   :  { %p2515_p1 = scmp.lt.u32.totalorder %s2511_s13, %s3288_s0 }
   0x5   :  { %p2517_p2 = pnand %p2515_p1, %p2512_p0 }
   0x7   :  { %2520 = shalt.err (!%p2517_p2)
}
   0x8   :  { %s2521_s18 = scalar_lea.vmem %s16_s10, 32  ;;  %p2526_p4 = scmp.lt.s32.totalorder %s16_s10, %s16_s10 }
   0x9   :  { %p2522_p3 = scmp.ne.s32.totalorder %s16_s10, %s2521_s18  ;;  %p2527_p5 = scmp.lt.s32.totalorder %s2521_s18, %s2521_s18 }
   0xb   :  { %p2528_p6 = por %p2527_p5, %p2526_p4 }
   0xd   :  { %p2529_p7 = pnand %p2528_p6, %p2522_p3 }
   0xf   :  { %2532 = shalt.err (!%p2529_p7)
}
  0x10   :  { %18 = dma.hbm_to_vmem [thread:$0]  %s3288_s0, 32, %s16_s10, [#allocation3]   ;;  %v29_v0 = vlaneseq }
  0x11   :  { %2543 = dma.done.wait [#allocation3], 32  }
  0x12   :  { %2544 = vsyncadd [#allocation3], 4294967264  ;;  %v2548_v1 = vmov 0.0|0.0   ;;  %v2582_v2 = vshrl.u32 %v29_v0, 7  ;;  %v2584_v3 = vand.u32 127, %v29_v0  ;;  %vm3291_vm0 = vmmov 0  }
  0x13   :  { %2191 = vmatprep.subr.bf16.mxu0 %v2548_v1  ;;  %2335 = vmatprep.subr.bf16.mxu1 %v2548_v1  ;;  %v2550_v4 = vmov 0.0   ;;  %v2551_v17 = vmov 1.0|1.0   ;;  %v24_v21 = vld [vmem:[#allocation2] sm:$0x3]  ;;  %v3310_v23 = vmov 0 }
  0x14   :  { %1803 = vmatprep.mubr.msk.f32.mxu0 %vm3291_vm0, %v2550_v4  ;;  %2013 = vmatprep.mubr.msk.f32.mxu1 %vm3291_vm0, %v2550_v4  ;;  %v31_v5 = vadd.s32 8, %v2582_v2  ;;  %v2592_v6 = vmul.u32 32, %v2584_v3  ;;  %v65_v7 = vadd.s32 1, %v2584_v3  ;;  %v32_v8 = vadd.s32 16, %v2582_v2  ;;  %v25_v22 = vld [vmem:[%s3289_s1] sm:$0x3] }
  0x15   :  { %v33_v10 = vadd.s32 24, %v2582_v2  ;;  %v34_v11 = vadd.s32 32, %v2582_v2  ;;  %v35_v13 = vadd.s32 40, %v2582_v2  ;;  %v36_v16 = vadd.s32 48, %v2582_v2  ;;  %s2533_s24 = scalar_lea.hbm %s3290_s2, 16 }
  0x16   :  { %vm49_vm1 = vcmp.ge.s32.totalorder %v2582_v2, %v2592_v6  ;;  %v2598_v9 = vmul.u32 32, %v65_v7  ;;  %vm50_vm2 = vcmp.ge.s32.totalorder %v31_v5, %v2592_v6  ;;  %vm51_vm6 = vcmp.ge.s32.totalorder %v32_v8, %v2592_v6  ;;  %p2534_p8 = scmp.ne.s32.totalorder %s3290_s2, %s2533_s24  ;;  %p2537_p9 = scmp.lt.u32.totalorder %s2533_s24, %s3290_s2 }
  0x17   :  { %vm52_vm9 = vcmp.ge.s32.totalorder %v33_v10, %v2592_v6  ;;  %vm53_vm13 = vcmp.ge.s32.totalorder %v34_v11, %v2592_v6  ;;  %v37_v19 = vadd.s32 56, %v2582_v2  ;;  %v38_v24 = vadd.s32 64, %v2582_v2 }
  0x18   :  { %vm67_vm3 = vcmp.lt.s32.totalorder %v2582_v2, %v2598_v9  ;;  %vm68_vm4 = vcmp.lt.s32.totalorder %v31_v5, %v2598_v9  ;;  %vm69_vm7 = vcmp.lt.s32.totalorder %v32_v8, %v2598_v9  ;;  %vm70_vm10 = vcmp.lt.s32.totalorder %v33_v10, %v2598_v9  ;;  %p2539_p10 = pnand %p2537_p9, %p2534_p8 }
  0x19   :  { %vm2606_vm5 = vmand %vm49_vm1, %vm67_vm3  ;;  %vm71_vm14 = vcmp.lt.s32.totalorder %v34_v11, %v2598_v9  ;;  %vm54_vm1 = vcmp.ge.s32.totalorder %v35_v13, %v2592_v6  ;;  %v39_v26 = vadd.s32 72, %v2582_v2  ;;  %v40_v28 = vadd.s32 80, %v2582_v2 }
  0x1a   :  { %vm2613_vm8 = vmand %vm50_vm2, %vm68_vm4  ;;  %vm72_vm2 = vcmp.lt.s32.totalorder %v35_v13, %v2598_v9  ;;  %v26_v29 = vsub.f32 %v25_v22, %v24_v21  ;;  %v1455_v30 = vsel %vm2606_vm5, 1.0, %v2550_v4  ;;  %v41_v33 = vadd.s32 88, %v2582_v2 }
  0x1b   :  { %vm2623_vm11 = vmpackc.low %vm2613_vm8, %vm2606_vm5  ;;  %vm75_vm5 = vcmp.lt.s32.totalorder %v38_v24, %v2598_v9  ;;  %v1456_v34 = vsel %vm2613_vm8, 1.0, %v2550_v4  ;;  %v2710_v36 = vsub.f32 %v1455_v30, %v1455_v30  ;;  %v3322_v38 = vmov 0 }
  0x1c   :  { %2193 = vmatpush3.bf16.msk.msra.mxu0 %vm2623_vm11, %v2551_v17  ;;  %2337 = vmatpush3.bf16.msk.msra.mxu1 %vm2623_vm11, %v2551_v17  ;;  %vm2634_vm12 = vmand %vm51_vm6, %vm69_vm7  ;;  %vm55_vm6 = vcmp.ge.s32.totalorder %v36_v16, %v2592_v6  ;;  %vm73_vm7 = vcmp.lt.s32.totalorder %v36_v16, %v2598_v9  ;;  %v27_v39 = vmul.f32 %v26_v29, %v26_v29  ;;  %v42_v42 = vadd.s32 96, %v2582_v2 }
  0x1d   :  { %2194 = vmatprep.subr.bf16.mxu0 %v2548_v1  ;;  %2338 = vmatprep.subr.bf16.mxu1 %v2548_v1  ;;  %vm2643_vm15 = vmand %vm52_vm9, %vm70_vm10  ;;  %vm56_vm10 = vcmp.ge.s32.totalorder %v37_v19, %v2592_v6  ;;  %v1457_v37 = vsel %vm2634_vm12, 1.0, %v2550_v4  ;;  %v28_v43 = vmul.f32 %v24_v21, %v24_v21  ;;  %v2745_v44 = vsub.f32 %v1456_v34, %v1456_v34 }
  0x1e   :  { %vm2656_vm3 = vmpackc.low %vm2643_vm15, %vm2634_vm12  ;;  %v1458_v40 = vsel %vm2643_vm15, 1.0, %v2550_v4  ;;  %v43_v46 = vadd.s32 104, %v2582_v2  ;;  %v2758_v47 = vsub.f32 %v1457_v37, %v1457_v37  ;;  %v3328_v48 = vmov 0 }
  0x1f   :  { %v3311_v23 = vsel %vm2656_vm3, 4294967295, %v3310_v23  ;;  %vm2661_vm4 = vmand %vm53_vm13, %vm71_vm14  ;;  %vm74_vm13 = vcmp.lt.s32.totalorder %v37_v19, %v2598_v9  ;;  %v2768_v49 = vand.u32 4294901760, %v27_v39  ;;  %v2770_v50 = vand.u32 4294901760, %v28_v43 }
  0x20   :  { %2196 = vmatpush3.bf16.msk.msra.mxu0 %vm2656_vm3, %v2551_v17  ;;  %2340 = vmatpush3.bf16.msk.msra.mxu1 %vm2656_vm3, %v2551_v17  ;;  %vm2674_vm9 = vmand %vm54_vm1, %vm72_vm2  ;;  %vm57_vm2 = vcmp.ge.s32.totalorder %v38_v24, %v2592_v6  ;;  %vm58_vm3 = vcmp.ge.s32.totalorder %v39_v26, %v2592_v6  ;;  %v2772_v51 = vsub.f32 %v1458_v40, %v1458_v40  ;;  %v1459_v52 = vsel %vm2661_vm4, 1.0, %v2550_v4 }
  0x21   :  { %2197 = vmatprep.subr.bf16.mxu0 %v2548_v1  ;;  %2341 = vmatprep.subr.bf16.mxu1 %v2548_v1  ;;  %vm2690_vm14 = vmpackc.low %vm2674_vm9, %vm2661_vm4  ;;  %v44_v54 = vadd.s32 112, %v2582_v2  ;;  %v1460_v55 = vsel %vm2674_vm9, 1.0, %v2550_v4  ;;  %v45_v57 = vadd.s32 120, %v2582_v2  ;;  %vm62_vm9 = vcmp.ge.s32.totalorder %v43_v46, %v2592_v6 }
  0x22   :  { %vm2694_vm1 = vmand %vm55_vm6, %vm73_vm7  ;;  %vm76_vm6 = vcmp.lt.s32.totalorder %v39_v26, %v2598_v9  ;;  %vm59_vm7 = vcmp.ge.s32.totalorder %v40_v28, %v2592_v6  ;;  %v225_v58 = vand.u32 4294901760, %v2710_v36  ;;  %v232_v59 = vand.u32 4294901760, %v2745_v44 }
  0x23   :  { %vm2704_vm0 = vmand %vm56_vm10, %vm74_vm13  ;;  %vm77_vm10 = vcmp.lt.s32.totalorder %v40_v28, %v2598_v9  ;;  %vm60_vm13 = vcmp.ge.s32.totalorder %v41_v33, %v2592_v6  ;;  %v2821_v61 = vsub.f32 %v27_v39, %v2768_v49  ;;  %v2824_v62 = vsub.f32 %v28_v43, %v2770_v50 }
  0x24   :  { %2199 = vmatpush3.bf16.msk.msra.mxu0 %vm2690_vm14, %v2551_v17  ;;  %2343 = vmatpush3.bf16.msk.msra.mxu1 %vm2690_vm14, %v2551_v17  ;;  %vm2725_vm8 = vmpackc.low %vm2704_vm0, %vm2694_vm1  ;;  %v239_v63 = vand.u32 4294901760, %v2758_v47  ;;  %v2827_v0 = vsub.f32 %v1459_v52, %v1459_v52  ;;  %v2829_v5 = vsub.f32 %v1460_v55, %v1460_v55  ;;  %v246_v8 = vand.u32 4294901760, %v2772_v51 }
  0x25   :  { %v3323_v38 = vsel %vm2725_vm8, 4294967295, %v3322_v38  ;;  %2200 = vmatprep.subr.bf16.mxu0 %v2548_v1  ;;  %2344 = vmatprep.subr.bf16.mxu1 %v2548_v1  ;;  %vm2739_vm12 = vmand %vm57_vm2, %vm75_vm5  ;;  %vm78_vm2 = vcmp.lt.s32.totalorder %v41_v33, %v2598_v9  ;;  %v1461_v10 = vsel %vm2694_vm1, 1.0, %v2550_v4  ;;  %v1462_v12 = vsel %vm2704_vm0, 1.0, %v2550_v4 }
  0x26   :  { %vm2751_vm15 = vmand %vm58_vm3, %vm76_vm6  ;;  %vm61_vm6 = vcmp.ge.s32.totalorder %v42_v42, %v2592_v6  ;;  %v1463_v13 = vsel %vm2739_vm12, 1.0, %v2550_v4  ;;  %v226_v14 = vsub.f32 %v2710_v36, %v225_v58  ;;  %v233_v16 = vsub.f32 %v2745_v44, %v232_v59 }
  0x27   :  { %vm2764_vm5 = vmpackc.low %vm2751_vm15, %vm2739_vm12  ;;  %vm82_vm1 = vcmp.lt.s32.totalorder %v45_v57, %v2598_v9  ;;  %v214_v18 = vand.u32 4294901760, %v2821_v61  ;;  %v3299_v19 = vand.u32 4294901760, %v2824_v62  ;;  %v240_v20 = vsub.f32 %v2758_v47, %v239_v63 }
  0x28   :  { %v3329_v48 = vsel %vm2764_vm5, 4294967295, %v3328_v48  ;;  %2202 = vmatpush3.bf16.msk.msra.mxu0 %vm2725_vm8, %v2551_v17  ;;  %2346 = vmatpush3.bf16.msk.msra.mxu1 %vm2725_vm8, %v2551_v17  ;;  %vm2787_vm3 = vmand %vm59_vm7, %vm77_vm10  ;;  %vm79_vm7 = vcmp.lt.s32.totalorder %v42_v42, %v2598_v9  ;;  %vm80_vm10 = vcmp.lt.s32.totalorder %v43_v46, %v2598_v9  ;;  %vm81_vm8 = vcmp.lt.s32.totalorder %v44_v54, %v2598_v9 }
  0x29   :  { %2203 = vmatprep.subr.bf16.mxu0 %v2548_v1  ;;  %2347 = vmatprep.subr.bf16.mxu1 %v2548_v1  ;;  %vm2801_vm4 = vmand %vm60_vm13, %vm78_vm2  ;;  %v2878_v21 = vsub.f32 %v1461_v10, %v1461_v10  ;;  %v247_v24 = vsub.f32 %v2772_v51, %v246_v8  ;;  %v253_v25 = vand.u32 4294901760, %v2827_v0  ;;  %v2898_v26 = vsub.f32 %v1462_v12, %v1462_v12 }
  0x2a   :  { %vm2816_vm13 = vmpackc.low %vm2801_vm4, %vm2787_vm3  ;;  %v1464_v27 = vsel %vm2751_vm15, 1.0, %v2550_v4  ;;  %v2903_v28 = vsub.f32 %v1463_v13, %v1463_v13  ;;  %v260_v30 = vand.u32 4294901760, %v2829_v5  ;;  %v1465_v32 = vsel %vm2787_vm3, 1.0, %v2550_v4 }
  0x2b   :  { %vm2839_vm2 = vmand %vm61_vm6, %vm79_vm7  ;;  %vm63_vm6 = vcmp.ge.s32.totalorder %v44_v54, %v2592_v6  ;;  %vm64_vm7 = vcmp.ge.s32.totalorder %v45_v57, %v2592_v6  ;;  %v1466_v33 = vsel %vm2801_vm4, 1.0, %v2550_v4  ;;  %v227_v35 = vand.u32 4294901760, %v226_v14 }
  0x2c   :  { %2205 = vmatpush3.bf16.msk.msra.mxu0 %vm2764_vm5, %v2551_v17  ;;  %2349 = vmatpush3.bf16.msk.msra.mxu1 %vm2764_vm5, %v2551_v17  ;;  %vm2853_vm5 = vmand %vm62_vm9, %vm80_vm10  ;;  %v234_v37 = vand.u32 4294901760, %v233_v16  ;;  %v1467_v39 = vsel %vm2839_vm2, 1.0, %v2550_v4  ;;  %v215_v40 = vsub.f32 %v2821_v61, %v214_v18  ;;  %v856_v9 = vsub.f32 %v2824_v62, %v3299_v19 }
  0x2d   :  { %2206 = vmatprep.subr.bf16.mxu0 %v2548_v1  ;;  %2350 = vmatprep.subr.bf16.mxu1 %v2548_v1  ;;  %vm2890_vm0 = vmpackc.low %vm2853_vm5, %vm2839_vm2  ;;  %v241_v41 = vand.u32 4294901760, %v240_v20  ;;  %v1468_v6 = vsel %vm2853_vm5, 1.0, %v2550_v4  ;;  %v248_v43 = vand.u32 4294901760, %v247_v24  ;;  %v254_v45 = vsub.f32 %v2827_v0, %v253_v25 }
  0x2e   :  { %vm2911_vm12 = vmand %vm63_vm6, %vm81_vm8  ;;  %v261_v53 = vsub.f32 %v2829_v5, %v260_v30  ;;  %v267_v54 = vand.u32 4294901760, %v2878_v21  ;;  %v274_v55 = vand.u32 4294901760, %v2898_v26  ;;  %v2970_v56 = vsub.f32 %v1464_v27, %v1464_v27 }
  0x2f   :  { %vm2926_vm15 = vmand %vm64_vm7, %vm82_vm1  ;;  %v1469_v42 = vsel %vm2911_vm12, 1.0, %v2550_v4  ;;  %v2972_v57 = vsub.f32 %v1465_v32, %v1465_v32  ;;  %v2974_v7 = vsub.f32 %v1466_v33, %v1466_v33  ;;  %v2976_v10 = vsub.f32 %v1467_v39, %v1467_v39 }
  0x30   :  { %2208 = vmatpush3.bf16.msk.msra.mxu0 %vm2816_vm13, %v2551_v17  ;;  %2352 = vmatpush3.bf16.msk.msra.mxu1 %vm2816_vm13, %v2551_v17  ;;  %v1470_v46 = vsel %vm2926_vm15, 1.0, %v2550_v4  ;;  %vm2963_vm8 = vmpackc.low %vm2926_vm15, %vm2911_vm12  ;;  %v2978_v11 = vsub.f32 %v1468_v6, %v1468_v6  ;;  %v2980_v12 = vsub.f32 %v1469_v42, %v1469_v42  ;;  %v216_v13 = vand.u32 4294901760, %v215_v40 }
  0x31   :  { %2209 = vmatprep.subr.bf16.mxu0 %v2548_v1  ;;  %2353 = vmatprep.subr.bf16.mxu1 %v2548_v1  ;;  %v857_v14 = vand.u32 4294901760, %v856_v9  ;;  %v2985_v16 = vsub.f32 %v1470_v46, %v1470_v46  ;;  %v2216_v20 = vpack.c.bf16 %v234_v37, %v227_v35  ;;  %v2219_v24 = vpack.c.bf16 %v248_v43, %v241_v41 }
  0x32   :  { %v255_v27 = vand.u32 4294901760, %v254_v45  ;;  %v262_v29 = vand.u32 4294901760, %v261_v53  ;;  %v268_v32 = vsub.f32 %v2878_v21, %v267_v54  ;;  %v275_v33 = vsub.f32 %v2898_v26, %v274_v55 }
  0x33   :  { %v281_v34 = vand.u32 4294901760, %v2903_v28  ;;  %v288_v39 = vand.u32 4294901760, %v2970_v56  ;;  %v295_v40 = vand.u32 4294901760, %v2972_v57  ;;  %v302_v9 = vand.u32 4294901760, %v2974_v7 }
  0x34   :  { %2211 = vmatpush3.bf16.msk.msra.mxu0 %vm2890_vm0, %v2551_v17  ;;  %2355 = vmatpush3.bf16.msk.msra.mxu1 %vm2890_vm0, %v2551_v17  ;;  %v309_v35 = vand.u32 4294901760, %v2976_v10  ;;  %v316_v37 = vand.u32 4294901760, %v2978_v11  ;;  %v323_v41 = vand.u32 4294901760, %v2980_v12  ;;  %v3005_v6 = vpack.c.bf16 %v232_v59, %v225_v58 }
  0x35   :  { %2212 = vmatprep.subr.bf16.mxu0 %v2548_v1  ;;  %2356 = vmatprep.subr.bf16.mxu1 %v2548_v1  ;;  %v3011_v42 = vpack.c.bf16 %v246_v8, %v239_v63  ;;  %v330_v43 = vand.u32 4294901760, %v2985_v16  ;;  %v3016_v45 = vpack.c.bf16 %v260_v30, %v253_v25  ;;  %v3018_v46 = vpack.c.bf16 %v274_v55, %v267_v54 }
  0x36   :  { %v3020_v53 = vpack.c.bf16 %v288_v39, %v281_v34  ;;  %v3024_v58 = vpack.c.bf16 %v302_v9, %v295_v40  ;;  %v3026_v59 = vpack.c.bf16 %v316_v37, %v309_v35  ;;  %vm3348_vm5 = vmmov 0  }
  0x37   :  { %v3032_v63 = vpack.c.bf16 %v330_v43, %v323_v41  ;;  %v2222_v8 = vpack.c.bf16 %v262_v29, %v255_v27  ;;  %v269_v25 = vand.u32 4294901760, %v268_v32  ;;  %v276_v30 = vand.u32 4294901760, %v275_v33 }
  0x38   :  { %2214 = vmatpush3.bf16.msk.msra.mxu0 %vm2963_vm8, %v2551_v17  ;;  %2358 = vmatpush3.bf16.msk.msra.mxu1 %vm2963_vm8, %v2551_v17  ;;  %v282_v54 = vsub.f32 %v2903_v28, %v281_v34  ;;  %v289_v55 = vsub.f32 %v2970_v56, %v288_v39  ;;  %v303_v27 = vsub.f32 %v2974_v7, %v302_v9 }
  0x39   :  { %2215 = vmatprep.subr.bf16.mxu0 %v2548_v1  ;;  %2359 = vmatprep.subr.bf16.mxu1 %v2548_v1  ;;  %v317_v34 = vsub.f32 %v2978_v11, %v316_v37  ;;  %vm3349_vm3 = vnez %v3311_v23  ;;  %vm3350_vm4 = vnez %v3323_v38  ;;  %vm3351_vm9 = vnez %v3329_v48 }
  0x3a   :  { %v290_v19 = vand.u32 4294901760, %v289_v55  ;;  %v304_v33 = vand.u32 4294901760, %v303_v27 }
  0x3b   :  { %1804 = vmatmul.mubr.f32.vlgmr.msra.gmra.mrb[0].mxu0 %v216_v13  ;;  %2014 = vmatmul.mubr.f32.vlgmr.msra.gmra.mrb[0].mxu1 %v857_v14  ;;  %v296_v13 = vsub.f32 %v2972_v57, %v295_v40  ;;  %v2225_v14 = vpack.c.bf16 %v276_v30, %v269_v25  ;;  %v318_v9 = vand.u32 4294901760, %v317_v34 }
  0x3c   :  { %2217 = vmatpush3.bf16.msra.mxu0 %v2216_v20  ;;  %2361 = vmatpush3.bf16.msra.mxu1 %v2216_v20  ;;  %v283_v20 = vand.u32 4294901760, %v282_v54 }
  0x3d   :  { %2218 = vmatprep.subr.bf16.mxu0 %v2548_v1  ;;  %2362 = vmatprep.subr.bf16.mxu1 %v2548_v1  ;;  %v297_v32 = vand.u32 4294901760, %v296_v13 }
  0x3e   :  { %1838 = vmatprep.mubr.msk.f32.mxu0 %vm3348_vm5, %v2550_v4  ;;  %2048 = vmatprep.mubr.msk.f32.mxu1 %vm3348_vm5, %v2550_v4  ;;  %v2228_v29 = vpack.c.bf16 %v290_v19, %v283_v20 }
  0x3f   :  { %v2231_v40 = vpack.c.bf16 %v304_v33, %v297_v32 }
  0x40   :  { %2220 = vmatpush3.bf16.msra.mxu0 %v2219_v24  ;;  %2364 = vmatpush3.bf16.msra.mxu1 %v2219_v24  ;;  %v310_v24 = vsub.f32 %v2976_v10, %v309_v35  ;;  %v331_v35 = vsub.f32 %v2985_v16, %v330_v43  ;;  %v2243_v43 = vpack.c.bf16 %v2772_v51, %v2758_v47 }
  0x41   :  { %2221 = vmatprep.subr.bf16.mxu0 %v2548_v1  ;;  %2365 = vmatprep.subr.bf16.mxu1 %v2548_v1  ;;  %v2252_v47 = vpack.c.bf16 %v2970_v56, %v2903_v28  ;;  %v2255_v51 = vpack.c.bf16 %v2974_v7, %v2972_v57 }
  0x42   :  { %v311_v39 = vand.u32 4294901760, %v310_v24  ;;  %v332_v25 = vand.u32 4294901760, %v331_v35 }
  0x44   :  { %2223 = vmatpush3.bf16.msra.mxu0 %v2222_v8  ;;  %2367 = vmatpush3.bf16.msra.mxu1 %v2222_v8  ;;  %v324_v8 = vsub.f32 %v2980_v12, %v323_v41  ;;  %v2234_v19 = vpack.c.bf16 %v318_v9, %v311_v39  ;;  %v2240_v41 = vpack.c.bf16 %v2745_v44, %v2710_v36 }
  0x45   :  { %2224 = vmatprep.subr.bf16.mxu0 %v2548_v1  ;;  %2368 = vmatprep.subr.bf16.mxu1 %v2548_v1  ;;  %v2246_v36 = vpack.c.bf16 %v2829_v5, %v2827_v0  ;;  %v2249_v44 = vpack.c.bf16 %v2898_v26, %v2878_v21  ;;  %v2258_v0 = vpack.c.bf16 %v2978_v11, %v2976_v10  ;;  %v3352_v21 = vand.u32 4294901760, %v2824_v62 }
  0x46   :  { %v325_v37 = vand.u32 4294901760, %v324_v8  ;;  %v2261_v5 = vpack.c.bf16 %v2985_v16, %v2980_v12 }
  0x48   :  { %2226 = vmatpush3.bf16.msra.mxu0 %v2225_v14  ;;  %2370 = vmatpush3.bf16.msra.mxu1 %v2225_v14  ;;  %v2237_v30 = vpack.c.bf16 %v332_v25, %v325_v37 }
  0x49   :  { %2227 = vmatprep.subr.bf16.mxu0 %v2548_v1  ;;  %2371 = vmatprep.subr.bf16.mxu1 %v2548_v1 }
  0x4c   :  { %2229 = vmatpush3.bf16.msra.mxu0 %v2228_v29  ;;  %2373 = vmatpush3.bf16.msra.mxu1 %v2228_v29 }
  0x4d   :  { %2230 = vmatprep.subr.bf16.mxu0 %v2548_v1  ;;  %2374 = vmatprep.subr.bf16.mxu1 %v2548_v1 }
  0x50   :  { %2232 = vmatpush3.bf16.msra.mxu0 %v2231_v40  ;;  %2376 = vmatpush3.bf16.msra.mxu1 %v2231_v40 }
  0x51   :  { %2233 = vmatprep.subr.bf16.mxu0 %v2548_v1  ;;  %2377 = vmatprep.subr.bf16.mxu1 %v2548_v1 }
  0x54   :  { %2235 = vmatpush3.bf16.msra.mxu0 %v2234_v19  ;;  %2379 = vmatpush3.bf16.msra.mxu1 %v2234_v19 }
  0x55   :  { %2236 = vmatprep.subr.bf16.mxu0 %v2548_v1  ;;  %2380 = vmatprep.subr.bf16.mxu1 %v2548_v1 }
  0x58   :  { %2238 = vmatpush3.bf16.msra.mxu0 %v2237_v30  ;;  %2382 = vmatpush3.bf16.msra.mxu1 %v2237_v30 }
  0x59   :  { %2239 = vmatprep.subr.bf16.mxu0 %v2548_v1  ;;  %2383 = vmatprep.subr.bf16.mxu1 %v2548_v1 }
  0x5b   :  { %1839 = vmatmul.mubr.f32.vlgmr.msra.gmra.mrb[0].mxu0 %v2768_v49  ;;  %2049 = vmatmul.mubr.f32.vlgmr.msra.gmra.mrb[0].mxu1 %v2770_v50 }
  0x5c   :  { %2241 = vmatpush3.bf16.msra.mxu0 %v2240_v41  ;;  %2385 = vmatpush3.bf16.msra.mxu1 %v2240_v41 }
  0x5d   :  { %2242 = vmatprep.subr.bf16.mxu0 %v2548_v1  ;;  %2386 = vmatprep.subr.bf16.mxu1 %v2548_v1 }
  0x5e   :  { %1873 = vmatprep.mubr.msk.f32.mxu0 %vm3348_vm5, %v2550_v4  ;;  %2083 = vmatprep.mubr.msk.f32.mxu1 %vm3348_vm5, %v2550_v4 }
  0x60   :  { %2244 = vmatpush3.bf16.msra.mxu0 %v2243_v43  ;;  %2388 = vmatpush3.bf16.msra.mxu1 %v2243_v43 }
  0x61   :  { %2245 = vmatprep.subr.bf16.mxu0 %v2548_v1  ;;  %2389 = vmatprep.subr.bf16.mxu1 %v2548_v1 }
  0x64   :  { %2247 = vmatpush3.bf16.msra.mxu0 %v2246_v36  ;;  %2391 = vmatpush3.bf16.msra.mxu1 %v2246_v36 }
  0x65   :  { %2248 = vmatprep.subr.bf16.mxu0 %v2548_v1  ;;  %2392 = vmatprep.subr.bf16.mxu1 %v2548_v1 }
  0x68   :  { %2250 = vmatpush3.bf16.msra.mxu0 %v2249_v44  ;;  %2394 = vmatpush3.bf16.msra.mxu1 %v2249_v44 }
  0x69   :  { %2251 = vmatprep.subr.bf16.mxu0 %v2548_v1  ;;  %2395 = vmatprep.subr.bf16.mxu1 %v2548_v1 }
  0x6c   :  { %2253 = vmatpush3.bf16.msra.mxu0 %v2252_v47  ;;  %2397 = vmatpush3.bf16.msra.mxu1 %v2252_v47 }
  0x6d   :  { %2254 = vmatprep.subr.bf16.mxu0 %v2548_v1  ;;  %2398 = vmatprep.subr.bf16.mxu1 %v2548_v1 }
  0x70   :  { %2256 = vmatpush3.bf16.msra.mxu0 %v2255_v51  ;;  %2400 = vmatpush3.bf16.msra.mxu1 %v2255_v51 }
  0x71   :  { %2257 = vmatprep.subr.bf16.mxu0 %v2548_v1  ;;  %2401 = vmatprep.subr.bf16.mxu1 %v2548_v1 }
  0x74   :  { %2259 = vmatpush3.bf16.msra.mxu0 %v2258_v0  ;;  %2403 = vmatpush3.bf16.msra.mxu1 %v2258_v0 }
  0x75   :  { %2260 = vmatprep.subr.bf16.mxu0 %v2548_v1  ;;  %2404 = vmatprep.subr.bf16.mxu1 %v2548_v1 }
  0x78   :  { %2262 = vmatpush3.bf16.msra.mxu0 %v2261_v5  ;;  %2406 = vmatpush3.bf16.msra.mxu1 %v2261_v5 }
  0x79   :  { %2263 = vmatprep.subr.bf16.mxu0 %v2548_v1  ;;  %2407 = vmatprep.subr.bf16.mxu1 %v2548_v1 }
  0x7b   :  { %1874 = vmatmul.mubr.f32.vlgmr.msra.gmra.mrb[0].mxu0 %v2821_v61  ;;  %2084 = vmatmul.mubr.f32.vlgmr.msra.gmra.mrb[0].mxu1 %v2824_v62 }
  0x7c   :  { %2265 = vmatpush3.bf16.msk.msra.mxu0 %vm2623_vm11, %v2551_v17  ;;  %2409 = vmatpush3.bf16.msk.msra.mxu1 %vm2623_vm11, %v2551_v17 }
  0x7d   :  { %2266 = vmatprep.subr.bf16.mxu0 %v2548_v1  ;;  %2410 = vmatprep.subr.bf16.mxu1 %v2548_v1 }
  0x7e   :  { %1908 = vmatprep.mubr.msk.f32.mxu0 %vm3348_vm5, %v2550_v4  ;;  %2118 = vmatprep.mubr.msk.f32.mxu1 %vm3348_vm5, %v2550_v4 }
  0x80   :  { %2268 = vmatpush3.bf16.msk.msra.mxu0 %vm3349_vm3, %v2551_v17  ;;  %2412 = vmatpush3.bf16.msk.msra.mxu1 %vm3349_vm3, %v2551_v17 }
  0x81   :  { %2269 = vmatprep.subr.bf16.mxu0 %v2548_v1  ;;  %2413 = vmatprep.subr.bf16.mxu1 %v2548_v1 }
  0x84   :  { %2271 = vmatpush3.bf16.msk.msra.mxu0 %vm2690_vm14, %v2551_v17  ;;  %2415 = vmatpush3.bf16.msk.msra.mxu1 %vm2690_vm14, %v2551_v17 }
  0x85   :  { %2272 = vmatprep.subr.bf16.mxu0 %v2548_v1  ;;  %2416 = vmatprep.subr.bf16.mxu1 %v2548_v1 }
  0x88   :  { %2274 = vmatpush3.bf16.msk.msra.mxu0 %vm3350_vm4, %v2551_v17  ;;  %2418 = vmatpush3.bf16.msk.msra.mxu1 %vm3350_vm4, %v2551_v17 }
  0x89   :  { %2275 = vmatprep.subr.bf16.mxu0 %v2548_v1  ;;  %2419 = vmatprep.subr.bf16.mxu1 %v2548_v1 }
  0x8c   :  { %2277 = vmatpush3.bf16.msk.msra.mxu0 %vm3351_vm9, %v2551_v17  ;;  %2421 = vmatpush3.bf16.msk.msra.mxu1 %vm3351_vm9, %v2551_v17 }
  0x8d   :  { %2278 = vmatprep.subr.bf16.mxu0 %v2548_v1  ;;  %2422 = vmatprep.subr.bf16.mxu1 %v2548_v1 }
  0x90   :  { %2280 = vmatpush3.bf16.msk.msra.mxu0 %vm2816_vm13, %v2551_v17  ;;  %2424 = vmatpush3.bf16.msk.msra.mxu1 %vm2816_vm13, %v2551_v17 }
  0x91   :  { %2281 = vmatprep.subr.bf16.mxu0 %v2548_v1  ;;  %2425 = vmatprep.subr.bf16.mxu1 %v2548_v1 }
  0x94   :  { %2283 = vmatpush3.bf16.msk.msra.mxu0 %vm2890_vm0, %v2551_v17  ;;  %2427 = vmatpush3.bf16.msk.msra.mxu1 %vm2890_vm0, %v2551_v17 }
  0x95   :  { %2284 = vmatprep.subr.bf16.mxu0 %v2548_v1  ;;  %2428 = vmatprep.subr.bf16.mxu1 %v2548_v1 }
  0x98   :  { %2286 = vmatpush3.bf16.msk.msra.mxu0 %vm2963_vm8, %v2551_v17  ;;  %2430 = vmatpush3.bf16.msk.msra.mxu1 %vm2963_vm8, %v2551_v17 }
  0x99   :  { %2287 = vmatprep.subr.bf16.mxu0 %v2548_v1  ;;  %2431 = vmatprep.subr.bf16.mxu1 %v2548_v1 }
  0x9b   :  { %1909 = vmatmul.mubr.f32.vlgmr.msra.gmra.mrb[0].mxu0 %v214_v18  ;;  %2119 = vmatmul.mubr.f32.vlgmr.msra.gmra.mrb[0].mxu1 %v3352_v21 }
  0x9c   :  { %2289 = vmatpush3.bf16.msra.mxu0 %v3005_v6  ;;  %2433 = vmatpush3.bf16.msra.mxu1 %v3005_v6 }
  0x9d   :  { %2290 = vmatprep.subr.bf16.mxu0 %v2548_v1  ;;  %2434 = vmatprep.subr.bf16.mxu1 %v2548_v1 }
  0x9e   :  { %1943 = vmatprep.mubr.msk.f32.mxu0 %vm3348_vm5, %v2550_v4  ;;  %2153 = vmatprep.mubr.msk.f32.mxu1 %vm3348_vm5, %v2550_v4 }
  0xa0   :  { %2292 = vmatpush3.bf16.msra.mxu0 %v3011_v42  ;;  %2436 = vmatpush3.bf16.msra.mxu1 %v3011_v42 }
  0xa1   :  { %2293 = vmatprep.subr.bf16.mxu0 %v2548_v1  ;;  %2437 = vmatprep.subr.bf16.mxu1 %v2548_v1 }
  0xa4   :  { %2295 = vmatpush3.bf16.msra.mxu0 %v3016_v45  ;;  %2439 = vmatpush3.bf16.msra.mxu1 %v3016_v45 }
  0xa5   :  { %2296 = vmatprep.subr.bf16.mxu0 %v2548_v1  ;;  %2440 = vmatprep.subr.bf16.mxu1 %v2548_v1 }
  0xa8   :  { %2298 = vmatpush3.bf16.msra.mxu0 %v3018_v46  ;;  %2442 = vmatpush3.bf16.msra.mxu1 %v3018_v46 }
  0xa9   :  { %2299 = vmatprep.subr.bf16.mxu0 %v2548_v1  ;;  %2443 = vmatprep.subr.bf16.mxu1 %v2548_v1 }
  0xac   :  { %2301 = vmatpush3.bf16.msra.mxu0 %v3020_v53  ;;  %2445 = vmatpush3.bf16.msra.mxu1 %v3020_v53 }
  0xad   :  { %2302 = vmatprep.subr.bf16.mxu0 %v2548_v1  ;;  %2446 = vmatprep.subr.bf16.mxu1 %v2548_v1 }
  0xb0   :  { %2304 = vmatpush3.bf16.msra.mxu0 %v3024_v58  ;;  %2448 = vmatpush3.bf16.msra.mxu1 %v3024_v58 }
  0xb1   :  { %2305 = vmatprep.subr.bf16.mxu0 %v2548_v1  ;;  %2449 = vmatprep.subr.bf16.mxu1 %v2548_v1 }
  0xb4   :  { %2307 = vmatpush3.bf16.msra.mxu0 %v3026_v59  ;;  %2451 = vmatpush3.bf16.msra.mxu1 %v3026_v59 }
  0xb5   :  { %2308 = vmatprep.subr.bf16.mxu0 %v2548_v1  ;;  %2452 = vmatprep.subr.bf16.mxu1 %v2548_v1 }
  0xb8   :  { %2310 = vmatpush3.bf16.msra.mxu0 %v3032_v63  ;;  %2454 = vmatpush3.bf16.msra.mxu1 %v3032_v63 }
  0xb9   :  { %2311 = vmatprep.subr.bf16.mxu0 %v2548_v1  ;;  %2455 = vmatprep.subr.bf16.mxu1 %v2548_v1 }
  0xbb   :  { %1944 = vmatmul.mubr.f32.vlgmr.msra.gmra.mrb[0].mxu0 %v2768_v49  ;;  %2154 = vmatmul.mubr.f32.vlgmr.msra.gmra.mrb[0].mxu1 %v2770_v50 }
  0xbc   :  { %2313 = vmatpush3.bf16.msk.msra.mxu0 %vm2623_vm11, %v2551_v17  ;;  %2457 = vmatpush3.bf16.msk.msra.mxu1 %vm2623_vm11, %v2551_v17 }
  0xbd   :  { %2314 = vmatprep.subr.bf16.mxu0 %v2548_v1  ;;  %2458 = vmatprep.subr.bf16.mxu1 %v2548_v1 }
  0xbe   :  { %1978 = vmatprep.mubr.msk.f32.mxu0 %vm3348_vm5, %v2550_v4  ;;  %2188 = vmatprep.mubr.msk.f32.mxu1 %vm3348_vm5, %v2550_v4 }
  0xc0   :  { %2316 = vmatpush3.bf16.msk.msra.mxu0 %vm3349_vm3, %v2551_v17  ;;  %2460 = vmatpush3.bf16.msk.msra.mxu1 %vm3349_vm3, %v2551_v17 }
  0xc1   :  { %2317 = vmatprep.subr.bf16.mxu0 %v2548_v1  ;;  %2461 = vmatprep.subr.bf16.mxu1 %v2548_v1 }
  0xc4   :  { %2319 = vmatpush3.bf16.msk.msra.mxu0 %vm2690_vm14, %v2551_v17  ;;  %2463 = vmatpush3.bf16.msk.msra.mxu1 %vm2690_vm14, %v2551_v17  ;;  %vm1428_vm14 = vcmask 25600  }
  0xc5   :  { %2320 = vmatprep.subr.bf16.mxu0 %v2548_v1  ;;  %2464 = vmatprep.subr.bf16.mxu1 %v2548_v1 }
  0xc8   :  { %2322 = vmatpush3.bf16.msk.msra.mxu0 %vm3350_vm4, %v2551_v17  ;;  %2466 = vmatpush3.bf16.msk.msra.mxu1 %vm3350_vm4, %v2551_v17 }
  0xc9   :  { %2323 = vmatprep.subr.bf16.mxu0 %v2548_v1  ;;  %2467 = vmatprep.subr.bf16.mxu1 %v2548_v1 }
  0xcc   :  { %2325 = vmatpush3.bf16.msk.msra.mxu0 %vm3351_vm9, %v2551_v17  ;;  %2469 = vmatpush3.bf16.msk.msra.mxu1 %vm3351_vm9, %v2551_v17 }
  0xcd   :  { %2326 = vmatprep.subr.bf16.mxu0 %v2548_v1  ;;  %2470 = vmatprep.subr.bf16.mxu1 %v2548_v1 }
  0xd0   :  { %2328 = vmatpush3.bf16.msk.msra.mxu0 %vm2816_vm13, %v2551_v17  ;;  %2472 = vmatpush3.bf16.msk.msra.mxu1 %vm2816_vm13, %v2551_v17 }
  0xd1   :  { %2329 = vmatprep.subr.bf16.mxu0 %v2548_v1  ;;  %2473 = vmatprep.subr.bf16.mxu1 %v2548_v1 }
  0xd4   :  { %2331 = vmatpush3.bf16.msk.msra.mxu0 %vm2890_vm0, %v2551_v17  ;;  %2475 = vmatpush3.bf16.msk.msra.mxu1 %vm2890_vm0, %v2551_v17 }
  0xd5   :  { %2332 = vmatprep.subr.bf16.mxu0 %v2548_v1  ;;  %2476 = vmatprep.subr.bf16.mxu1 %v2548_v1  ;;  %v1424_v1 = vmul.u32 4, %v2582_v2 }
  0xd7   :  { %v1425_v62 = vadd.s32 %v1424_v1, %v2584_v3 }
  0xd8   :  { %2334 = vmatpush3.bf16.msk.msra.mxu0 %vm2963_vm8, %v2551_v17  ;;  %2478 = vmatpush3.bf16.msk.msra.mxu1 %vm2963_vm8, %v2551_v17 }
  0xd9   :  { %vm1426_vm11 = vcmp.lt.s32.totalorder %v1425_v62, 8 }
  0xdb   :  { %1979 = vmatmul.mubr.f32.vlgmr.msra.gmra.mrb[0].mxu0 %v2768_v49  ;;  %2189 = vmatmul.mubr.f32.vlgmr.msra.gmra.mrb[0].mxu1 %v2770_v50 }
 0x1ae   :  { %v768_v4 = vpop.f32.mrb[0].mxu0  ;;  %v1409_v15 = vpop.f32.mrb[0].mxu1 }
 0x1af   :  { %v1415_v23 = vsub.f32 1.0, %v1409_v15  ;;  %v1980_v31 = vpop.f32.mrb[1].mxu0  ;;  %v2190_v38 = vpop.f32.mrb[1].mxu1  ;;  %2507 = vlog2.f32 %v768_v4 }
 0x1b1   :  { %v1416_v48 = vadd.f32 1e-06, %v1415_v23 }
 0x1b3   :  { %2509 = vlog2.f32 %v1416_v48 }
 0x1b9   :  { %v2508_v60 = vpop.eup %2507 }
 0x1ba   :  { %v1414_v17 = vmul.f32 0.6931472, %v2508_v60 }
 0x1bd   :  { %v2510_v61 = vpop.eup %2509 }
 0x1be   :  { %v1418_v18 = vmul.f32 0.6931472, %v2510_v61 }
 0x1c0   :  { %v1419_v22 = vmul.f32 33.0, %v1418_v18 }
 0x1c2   :  { %v1420_v49 = vsub.f32 %v1414_v17, %v1419_v22 }
 0x1c4   :  { %v1427_v50 = vsel %vm1426_vm11, %v1420_v49, 0.0 }
 0x1c5   :  { %v1429_v26 = vsel %vm1428_vm14, %v1427_v50, 0.0 }
 0x1c6   :  { %1430 = vadd.xlane.f32.xlu0 %v1429_v26 }
 0x253   :  { %v1431_v28 = vpop.xlane.xlu0 %1430 }
 0x254   :  { %v1432_v52 = vrot.slane %v1431_v28, 4 }
 0x256   :  { %v1433_v56 = vadd.f32 %v1432_v52, %v1431_v28 }
 0x258   :  { %v1434_v57 = vrot.slane %v1433_v56, 2 }
 0x25a   :  { %v1435_v7 = vadd.f32 %v1434_v57, %v1433_v56 }
 0x25c   :  { %v1436_v10 = vrot.slane %v1435_v7, 1 }
 0x25e   :  { %v1437_v2 = vadd.f32 %v1436_v10, %v1435_v7 }
 0x260   :  { %2499 = vpush %v1437_v2 }
 0x291   :  { %s2500_s1 = spop %2499 }
 0x292   :  { %1440 = sst [smem:[#allocation5]] %s2500_s1 }
 0x293   :  { %2542 = shalt.err (!%p2539_p10)
}
 0x294   :  { %s2552_s29 = smov [#allocation5]  }
 0x295   :  { %1448 = dma.smem_to_hbm %s2552_s29, 16, %s3290_s2, [#allocation4]  }
 0x296   :  { %2545 = dma.done.wait [#allocation4], 16  }
 0x297   :  { %2546 = vsyncadd [#allocation4], 4294967280 }
 0x298   :  { %1452 = sfence }
 0x299   :  { %1453 = vsyncpa [#allocation3], 1 }
 0x29a   :  { %1454 = vsyncpa [#allocation4], 1 }

</bundles_post_ra>
